<compile_context>
chip_gen: v6e
topology: v6e:2x2x1
jax: 0.10.0
libtpu: 0.0.40
codegen_flags: <defaults>
</compile_context>

<pallas_src>
import functools

import jax
import jax.numpy as jnp
from jax.experimental import pallas as pl
from jax.experimental.pallas import tpu as pltpu

LANES = 128


def _sublane_multiple(dtype) -> int:
    # f32/i32 -> 8, bf16/f16 -> 16, int8/uint8/bool -> 32 (sublane packing).
    return max(8, 32 // jnp.dtype(dtype).itemsize)


def _focal_loss_kernel(x_ref, t_ref, out_ref, *, gamma, n_elems, binary_target):
    block_rows = x_ref.shape[0]

    # Stream native dtype from HBM; upcast to f32 on the VPU.
    x = x_ref[...].astype(jnp.float32)
    t = t_ref[...].astype(jnp.float32)

    # Stable softplus(-x) = max(-x, 0) + log(1 + exp(-|x|))       (1 exp, 1 log)
    sp_negx = jnp.maximum(-x, 0.0) + jnp.log(1.0 + jnp.exp(-jnp.abs(x)))

    # PyTorch: x - x*t + max(-x,0) + log(exp(-max) + exp(-x-max)) == x - x*t + softplus(-x)
    base = x - x * t + sp_negx

    # invprobs = logsigmoid(-x*(2t-1)) = -softplus(x*(2t-1))
    if binary_target:
        # For t in {0,1}: softplus(x*(2t-1)) = softplus(x) if t==1 else softplus(-x),
        # and softplus(x) = x + softplus(-x)  -> reuse sp_negx, no extra exp/log.
        sp_z = jnp.where(t >= 0.5, x + sp_negx, sp_negx)
    else:
        z = x * (t * 2.0 - 1.0)
        sp_z = jnp.maximum(z, 0.0) + jnp.log(1.0 + jnp.exp(-jnp.abs(z)))

    loss = jnp.exp(-gamma * sp_z) * base                          # (1 exp)

    # In-kernel mask of lane-padding / grid-overhang elements (no HBM mask tensor).
    row0 = pl.program_id(0) * block_rows
    rid = jax.lax.broadcasted_iota(jnp.int32, (block_rows, LANES), 0)
    cid = jax.lax.broadcasted_iota(jnp.int32, (block_rows, LANES), 1)
    gidx = (row0 + rid) * LANES + cid          # valid for n < 2**31 elements
    loss = jnp.where(gidx < n_elems, loss, 0.0)

    # Reduce the tile to a vreg-shaped (8, 128) partial with VPU vector adds.
    if block_rows % 8 == 0:
        partial = loss.reshape(block_rows // 8, 8, LANES).sum(axis=0)
    else:
        # Tiny full-extent block whose row count isn't a multiple of 8.
        partial = jnp.where(
            jax.lax.broadcasted_iota(jnp.int32, (8, LANES), 0) == 0,
            jnp.sum(loss, axis=0, keepdims=True),
            0.0,
        )
    out_ref[...] = partial[None]


def focal_loss(x, target, gamma, *, tile_rows=1024, assume_binary_target=True):
    """Pallas implementation of FocalLoss.forward; returns a scalar (mean)."""
    if x.shape != target.shape:
        raise ValueError(
            "Target size ({}) must be the same as input size ({})".format(
                target.shape, x.shape
            )
        )

    n = int(x.size)
    xf = jnp.reshape(x, (-1,))
    tf = jnp.reshape(target, (-1,))

    lane_pad = (-n) % LANES
    if lane_pad:
        # Rare ragged-lane case; padded elements are masked inside the kernel.
        xf = jnp.pad(xf, (0, lane_pad))
        tf = jnp.pad(tf, (0, lane_pad))

    rows = (n + lane_pad) // LANES
    xf = xf.reshape(rows, LANES)
    tf = tf.reshape(rows, LANES)

    sub = max(_sublane_multiple(xf.dtype), _sublane_multiple(tf.dtype))
    if rows <= tile_rows:
        block_rows = rows            # full-extent block: always a legal shape
        grid_steps = 1
    else:
        block_rows = max(sub, (tile_rows // sub) * sub)
        grid_steps = -(-rows // block_rows)   # cdiv; overhang masked in-kernel

    kernel = functools.partial(
        _focal_loss_kernel,
        gamma=float(gamma),
        n_elems=n,
        binary_target=assume_binary_target,
    )

    partials = pl.pallas_call(
        kernel,
        out_shape=jax.ShapeDtypeStruct((grid_steps, 8, LANES), jnp.float32),
        grid_spec=pltpu.PrefetchScalarGridSpec(
            num_scalar_prefetch=0,
            grid=(grid_steps,),
            in_specs=[
                pl.BlockSpec((block_rows, LANES), lambda i: (i, 0)),
                pl.BlockSpec((block_rows, LANES), lambda i: (i, 0)),
            ],
            out_specs=pl.BlockSpec((1, 8, LANES), lambda i: (i, 0, 0)),
        ),
        compiler_params=pltpu.CompilerParams(
            # Fully independent grid steps -> megacore-shardable on v7x,
            # harmless no-op on single-core v5e/v6e.
            dimension_semantics=("parallel",),
        ),
    )(xf, tf)

    # Tiny (grid_steps, 8, 128) reduction + mean in plain XLA.
    return jnp.sum(partials) / jnp.float32(n)


def focal_loss_ref(x, target, gamma):
    """Pure-JAX reference mirroring the PyTorch forward exactly."""
    x = x.astype(jnp.float32)
    t = target.astype(jnp.float32)
    max_val = jnp.maximum(-x, 0.0)
    loss = x - x * t + max_val + jnp.log(jnp.exp(-max_val) + jnp.exp(-x - max_val))
    invprobs = jax.nn.log_sigmoid(-x * (t * 2.0 - 1.0))
    loss = jnp.exp(invprobs * gamma) * loss
    return jnp.mean(loss)


if __name__ == "__main__":
    gamma = 2.0  # FocalLoss(gamma=2.0)

    key = jax.random.PRNGKey(0)
    k1, k2 = jax.random.split(key)

    # NCHW logits and binary targets, as the UNET tile model would produce.
    x = jax.random.normal(k1, (2, 4, 16, 16), dtype=jnp.float32)
    target = (jax.random.uniform(k2, (2, 4, 16, 16)) > 0.5).astype(jnp.float32)

    out = focal_loss(x, target, gamma)
    out = jax.block_until_ready(out)

    ref = focal_loss_ref(x, target, gamma)
    assert jnp.allclose(out, ref, rtol=1e-5, atol=1e-6), (out, ref)

    print("KERNEL_OK")
</pallas_src>

<mosaic_0001>
module attributes {stable_mosaic.version = 11 : i64} {
  func.func @_focal_loss_kernel(%arg0: i32, %arg1: memref<16x128xf32, #tpu.memory_space<vmem>>, %arg2: memref<16x128xf32, #tpu.memory_space<vmem>>, %arg3: memref<1x8x128xf32, #tpu.memory_space<vmem>>) attributes {dimension_semantics = [#tpu.dimension_semantics<parallel>], iteration_bounds = array<i64: 1>, scalar_prefetch = 0 : i64, scratch_operands = 0 : i64, tpu.core_type = #tpu.core_type<tc>, window_params = [{transform_indices = @transform_0, window_bounds = array<i64: 16, 128>}, {transform_indices = @transform_1, window_bounds = array<i64: 16, 128>}, {transform_indices = @transform_2, window_bounds = array<i64: 1, 8, 128>}]} {
    %c0 = arith.constant 0 : index
    %c0_0 = arith.constant 0 : index
    %0 = vector.load %arg1[%c0, %c0_0] : memref<16x128xf32, #tpu.memory_space<vmem>>, vector<16x128xf32>
    %c0_1 = arith.constant 0 : index
    %c0_2 = arith.constant 0 : index
    %1 = vector.load %arg2[%c0_1, %c0_2] : memref<16x128xf32, #tpu.memory_space<vmem>>, vector<16x128xf32>
    %cst = arith.constant 0.000000e+00 : f32
    %2 = vector.broadcast %cst : f32 to vector<16x128xf32>
    %3 = arith.subf %2, %0 : vector<16x128xf32>
    %cst_3 = arith.constant 0.000000e+00 : f32
    %4 = vector.broadcast %cst_3 : f32 to vector<16x128xf32>
    %5 = arith.maximumf %3, %4 : vector<16x128xf32>
    %6 = math.absf %0 : vector<16x128xf32>
    %cst_4 = arith.constant 0.000000e+00 : f32
    %7 = vector.broadcast %cst_4 : f32 to vector<16x128xf32>
    %8 = arith.subf %7, %6 : vector<16x128xf32>
    %9 = math.exp %8 : vector<16x128xf32>
    %cst_5 = arith.constant 1.000000e+00 : f32
    %10 = vector.broadcast %cst_5 : f32 to vector<16x128xf32>
    %11 = arith.addf %10, %9 : vector<16x128xf32>
    %12 = math.log %11 : vector<16x128xf32>
    %13 = arith.addf %5, %12 : vector<16x128xf32>
    %14 = arith.mulf %0, %1 : vector<16x128xf32>
    %15 = arith.subf %0, %14 : vector<16x128xf32>
    %16 = arith.addf %15, %13 : vector<16x128xf32>
    %cst_6 = arith.constant 5.000000e-01 : f32
    %17 = vector.broadcast %cst_6 : f32 to vector<16x128xf32>
    %18 = arith.cmpf oge, %1, %17 : vector<16x128xf32>
    %19 = arith.addf %0, %13 : vector<16x128xf32>
    %20 = arith.select %18, %19, %13 : vector<16x128xi1>, vector<16x128xf32>
    %cst_7 = arith.constant -2.000000e+00 : f32
    %21 = vector.broadcast %cst_7 : f32 to vector<16x128xf32>
    %22 = arith.mulf %21, %20 : vector<16x128xf32>
    %23 = math.exp %22 : vector<16x128xf32>
    %24 = arith.mulf %23, %16 : vector<16x128xf32>
    %c16_i32 = arith.constant 16 : i32
    %25 = arith.muli %arg0, %c16_i32 : i32
    %26 = tpu.iota {dimensions = array<i32: 0>} : vector<16x128xi32>
    %27 = tpu.iota {dimensions = array<i32: 1>} : vector<16x128xi32>
    %28 = vector.broadcast %25 : i32 to vector<16x128xi32>
    %29 = arith.addi %28, %26 : vector<16x128xi32>
    %c128_i32 = arith.constant 128 : i32
    %30 = vector.broadcast %c128_i32 : i32 to vector<16x128xi32>
    %31 = arith.muli %29, %30 : vector<16x128xi32>
    %32 = arith.addi %31, %27 : vector<16x128xi32>
    %c2048_i32 = arith.constant 2048 : i32
    %33 = vector.broadcast %c2048_i32 : i32 to vector<16x128xi32>
    %34 = arith.cmpi slt, %32, %33 : vector<16x128xi32>
    %cst_8 = arith.constant 0.000000e+00 : f32
    %35 = vector.broadcast %cst_8 : f32 to vector<16x128xf32>
    %36 = arith.select %34, %24, %35 : vector<16x128xi1>, vector<16x128xf32>
    %37 = vector.shape_cast %36 : vector<16x128xf32> to vector<2x8x128xf32>
    %cst_9 = arith.constant dense<0.000000e+00> : vector<8x128xf32>
    %38 = vector.multi_reduction <add>, %37, %cst_9 [0] : vector<2x8x128xf32> to vector<8x128xf32>
    %39 = vector.shape_cast %38 : vector<8x128xf32> to vector<1x8x128xf32>
    %c0_10 = arith.constant 0 : index
    %c0_11 = arith.constant 0 : index
    %c0_12 = arith.constant 0 : index
    %40 = vector.load %arg3[%c0_10, %c0_11, %c0_12] : memref<1x8x128xf32, #tpu.memory_space<vmem>>, vector<1x8x128xf32>
    tpu.vector_store %arg3[%c0_10, %c0_11, %c0_12], %39 {strides = array<i32>} : memref<1x8x128xf32, #tpu.memory_space<vmem>>, vector<1x8x128xf32>,
    return
  }
  func.func @transform_0(%arg0: i32) -> (i32, i32) {
    %c0_i32 = arith.constant 0 : i32
    %c0_i32_0 = arith.constant 0 : i32
    return %arg0, %c0_i32 : i32, i32
  }
  func.func @transform_1(%arg0: i32) -> (i32, i32) {
    %c0_i32 = arith.constant 0 : i32
    %c0_i32_0 = arith.constant 0 : i32
    return %arg0, %c0_i32 : i32, i32
  }
  func.func @transform_2(%arg0: i32) -> (i32, i32, i32) {
    %c0_i32 = arith.constant 0 : i32
    %c0_i32_0 = arith.constant 0 : i32
    %c0_i32_1 = arith.constant 0 : i32
    return %arg0, %c0_i32, %c0_i32_0 : i32, i32, i32
  }
}

</mosaic_0001>

<bundles_post_ra>
// kernel: tpu_custom_call.1
= control target key start
LH: loop header
LB: loop body
LE: loop exit
PB: predicated region body
PF: predicated region fallthrough
CT: control target
= control target key end

     0   :  { %7 = vsyncpa [#allocation3], 0  ;;  %s231_s0 = inlined_call_operand.hbm [shape: f32[16,128], index: 0, kind: input, shape index: {}]   ;;  %s232_s1 = inlined_call_operand.hbm [shape: f32[16,128], index: 1, kind: input, shape index: {}]   ;;  %s233_s2 = inlined_call_operand.hbm [shape: f32[1,8,128], index: 2, kind: output, shape index: {}]  }
   0x1   :  { %8 = vsyncpa [#allocation6], 0 }
   0x2   :  { %9 = vsyncpa [#allocation4], 0  ;;  %s202_s9 = smov [#allocation2]  }
   0x3   :  { %s15_s10 = sshll.u32 %s202_s9, 4  ;;  %s16_s10 = int_to_ptr.vmem [resolvable:$true] %s15_s10 }
   0x4   :  { %s144_s11 = scalar_lea.vmem %s16_s10, 256  ;;  %p149_p1 = scmp.lt.s32.totalorder %s16_s10, %s16_s10 }
   0x5   :  { %p145_p0 = scmp.ne.s32.totalorder %s16_s10, %s144_s11  ;;  %p150_p2 = scmp.lt.s32.totalorder %s144_s11, %s144_s11 }
   0x7   :  { %p151_p3 = por %p150_p2, %p149_p1 }
   0x9   :  { %p152_p4 = pnand %p151_p3, %p145_p0 }
   0xb   :  { %155 = shalt.err (!%p152_p4)
}
   0xc   :  { %s203_s12 = smov 128   ;;  %s204_s13 = smov 8  }
   0xd   :  { %21 = dma.hbm_to_vmem [thread:$0]  %s231_s0, 256, %s16_s10, [#allocation3], %s203_s12, %s203_s12, %s204_s13  }
   0xe   :  { %s205_s16 = smov [#allocation5]  }
   0xf   :  { %s27_s17 = sshll.u32 %s205_s16, 4  ;;  %s28_s17 = int_to_ptr.vmem [resolvable:$true] %s27_s17 }
  0x10   :  { %s164_s18 = scalar_lea.vmem %s28_s17, 256  ;;  %p169_p6 = scmp.lt.s32.totalorder %s28_s17, %s28_s17 }
  0x11   :  { %p165_p5 = scmp.ne.s32.totalorder %s28_s17, %s164_s18  ;;  %p170_p7 = scmp.lt.s32.totalorder %s164_s18, %s164_s18 }
  0x13   :  { %p171_p8 = por %p170_p7, %p169_p6 }
  0x15   :  { %p172_p9 = pnand %p171_p8, %p165_p5 }
  0x17   :  { %175 = shalt.err (!%p172_p9)
}
  0x18   :  { %33 = dma.hbm_to_vmem [thread:$0]  %s232_s1, 256, %s28_s17, [#allocation6], %s203_s12, %s203_s12, %s204_s13  }
  0x19   :  { %196 = dma.done.wait [#allocation3], 256  }
  0x1a   :  { %197 = vsyncadd [#allocation3], 4294967040 }
  0x1b   :  { %198 = dma.done.wait [#allocation6], 256  }
  0x1c   :  { %199 = vsyncadd [#allocation6], 4294967040  ;;  %v40_v0 = vld [vmem:[#allocation2] sm:$0xff]  ;;  %v41_v1 = vld [vmem:[#allocation2 + $0x8] sm:$0xff]  ;;  %v85_v26 = vlaneseq  ;;  %s206_s0 = smov [#allocation7]  }
  0x1d   :  { %v48_v2 = vand.u32 2147483647, %v40_v0  ;;  %v49_v3 = vand.u32 2147483647, %v41_v1  ;;  %v44_v12 = vsub.f32 0.0, %v40_v0  ;;  %v45_v13 = vsub.f32 0.0, %v41_v1 }
  0x1e   :  { %v42_v18 = vld [vmem:[#allocation5] sm:$0xff]  ;;  %v43_v20 = vld [vmem:[#allocation5 + $0x8] sm:$0xff]  ;;  %v86_v32 = vshrl.u32 %v85_v26, 7  ;;  %v89_v37 = vand.u32 127, %v85_v26  ;;  %s109_s1 = sshll.u32 %s206_s0, 4  ;;  %s110_s1 = int_to_ptr.vmem [resolvable:$true] %s109_s1 }
  0x1f   :  { %v50_v4 = vsub.f32 0.0, %v48_v2  ;;  %v51_v5 = vsub.f32 0.0, %v49_v3  ;;  %v46_v14 = vmax.f32 %v44_v12, 0.0  ;;  %v47_v16 = vmax.f32 %v45_v13, 0.0  ;;  %s176_s21 = scalar_lea.vmem %s110_s1, 128  ;;  %p181_p11 = scmp.lt.s32.totalorder %s110_s1, %s110_s1 }
  0x20   :  { %vm70_vm0 = vcmp.ge.f32.partialorder %v42_v18, 0.5  ;;  %vm71_vm1 = vcmp.ge.f32.partialorder %v43_v20, 0.5  ;;  %v64_v34 = vmul.f32 %v42_v18, %v40_v0  ;;  %v87_v35 = vadd.s32 8, %v86_v32  ;;  %p177_p10 = scmp.ne.s32.totalorder %s110_s1, %s176_s21  ;;  %p182_p12 = scmp.lt.s32.totalorder %s176_s21, %s176_s21 }
  0x21   :  { %v52_v6 = vmul.f32 1.442695, %v50_v4  ;;  %v54_v7 = vmul.f32 1.442695, %v51_v5  ;;  %v65_v36 = vmul.f32 %v43_v20, %v41_v1  ;;  %v93_v38 = vmul.u32 128, %v86_v32 }
  0x22   :  { %v66_v39 = vsub.f32 %v40_v0, %v64_v34  ;;  %v94_v40 = vmul.u32 128, %v87_v35  ;;  %p183_p13 = por %p182_p12, %p181_p11 }
  0x23   :  { %124 = vpow2.f32 %v52_v6  ;;  %v67_v41 = vsub.f32 %v41_v1, %v65_v36  ;;  %v95_v42 = vadd.s32 %v93_v38, %v89_v37 }
  0x24   :  { %126 = vpow2.f32 %v54_v7  ;;  %v96_v44 = vadd.s32 %v94_v40, %v89_v37  ;;  %p184_p0 = pnand %p183_p13, %p177_p10 }
  0x25   :  { %vm97_vm2 = vcmp.lt.s32.totalorder %v95_v42, 2048 }
  0x26   :  { %vm98_vm3 = vcmp.lt.s32.totalorder %v96_v44, 2048 }
  0x30   :  { %v125_v8 = vpop.eup %124 }
  0x31   :  { %v127_v9 = vpop.eup %126  ;;  %v56_v10 = vadd.f32 1.0, %v125_v8 }
  0x32   :  { %v57_v11 = vadd.f32 1.0, %v127_v9 }
  0x33   :  { %128 = vlog2.f32 %v56_v10 }
  0x34   :  { %130 = vlog2.f32 %v57_v11 }
  0x40   :  { %v129_v15 = vpop.eup %128 }
  0x41   :  { %v131_v17 = vpop.eup %130  ;;  %v59_v19 = vmul.f32 0.6931472, %v129_v15 }
  0x42   :  { %v61_v21 = vmul.f32 0.6931472, %v131_v17 }
  0x43   :  { %v62_v22 = vadd.f32 %v59_v19, %v46_v14 }
  0x44   :  { %v63_v23 = vadd.f32 %v61_v21, %v47_v16 }
  0x45   :  { %v72_v24 = vadd.f32 %v62_v22, %v40_v0  ;;  %v68_v43 = vadd.f32 %v66_v39, %v62_v22 }
  0x46   :  { %v73_v25 = vadd.f32 %v63_v23, %v41_v1  ;;  %v69_v45 = vadd.f32 %v67_v41, %v63_v23 }
  0x47   :  { %v74_v27 = vsel %vm70_vm0, %v72_v24, %v62_v22 }
  0x48   :  { %v75_v28 = vsel %vm71_vm1, %v73_v25, %v63_v23  ;;  %v76_v29 = vmul.f32 -2.0, %v74_v27 }
  0x49   :  { %v77_v30 = vmul.f32 -2.0, %v75_v28 }
  0x4a   :  { %v78_v31 = vmul.f32 1.442695, %v76_v29 }
  0x4b   :  { %v80_v33 = vmul.f32 1.442695, %v77_v30 }
  0x4c   :  { %132 = vpow2.f32 %v78_v31 }
  0x4d   :  { %134 = vpow2.f32 %v80_v33 }
  0x59   :  { %v133_v46 = vpop.eup %132 }
  0x5a   :  { %v135_v47 = vpop.eup %134  ;;  %v82_v48 = vmul.f32 %v133_v46, %v68_v43 }
  0x5b   :  { %v83_v49 = vmul.f32 %v135_v47, %v69_v45 }
  0x5c   :  { %v99_v50 = vsel %vm97_vm2, %v82_v48, 0.0 }
  0x5d   :  { %v100_v51 = vsel %vm98_vm3, %v83_v49, 0.0 }
  0x5e   :  { %v101_v52 = vadd.f32 %v100_v51, %v99_v50 }
  0x60   :  { %102 = vst [vmem:[#allocation7] sm:$0xff] %v101_v52 }
  0x61   :  { %187 = shalt.err (!%p184_p0)
}
  0x62   :  { %112 = dma.vmem_to_hbm [thread:$0]  %s110_s1, 128, %s233_s2, [#allocation4]  }
  0x63   :  { %200 = dma.done.wait [#allocation4], 128  }
  0x64   :  { %201 = vsyncadd [#allocation4], 4294967168 }
  0x65   :  { %116 = vsyncpa [#allocation3], 1 }
  0x66   :  { %117 = vsyncpa [#allocation6], 1 }
  0x67   :  { %118 = vsyncpa [#allocation4], 1 }

</bundles_post_ra>
